<compile_context>
chip_gen: v5e
topology: v5e:2x2
jax: 0.10.0
libtpu: 0.0.40
codegen_flags: <defaults>
</compile_context>

<pallas_src>
import jax
import jax.numpy as jnp
from jax.experimental import pallas as pl
from jax.experimental.pallas import tpu as pltpu

LEAKY_SLOPE = 0.01   # torch.nn.LeakyReLU default negative_slope
LANE = 128
SUBLANE = 16         # bf16 sublane granule (also valid for f32)


def _round_up(n, m):
    return (n + m - 1) // m * m


def _cdiv(a, b):
    return -(-a // b)


def _factor_encoder_kernel(x_ref, w1_ref, b1_ref, w2_ref, b2_ref,
                           w3_ref, b3_ref, o_ref):
    x = x_ref[...]                                               # bf16 [tb, in_dim]

    # fc_1 : Linear + (Dropout == identity) + LeakyReLU  (f32 accumulation)
    h1 = jnp.dot(x, w1_ref[...], preferred_element_type=jnp.float32) + b1_ref[...]
    h1 = jnp.maximum(h1, LEAKY_SLOPE * h1)

    # fc_2 : Linear + (Dropout == identity) + LeakyReLU
    h2 = jnp.dot(h1.astype(w2_ref.dtype), w2_ref[...],
                 preferred_element_type=jnp.float32) + b2_ref[...]
    h2 = jnp.maximum(h2, LEAKY_SLOPE * h2)

    # fc_mean_var : Linear -> fused (tb, 2*latent) store (no lane padding).
    o = jnp.dot(h2.astype(w3_ref.dtype), w3_ref[...],
                preferred_element_type=jnp.float32) + b3_ref[...]
    o_ref[...] = o.astype(o_ref.dtype)


def prepare_params(params, *, compute_dtype=jnp.bfloat16):
    """Pad the hidden dim to the 128-lane granule and cast weights to bf16.

    Call once, outside the hot path.  Zero padding is exact: LeakyReLU(0)=0
    and zero rows/cols contribute nothing to the matmuls.
    """
    hidden = params["W1"].shape[1]
    ph = _round_up(hidden, LANE) - hidden
    return {
        "W1": jnp.pad(params["W1"], ((0, 0), (0, ph))).astype(compute_dtype),
        "b1": jnp.pad(params["b1"], ((0, 0), (0, ph))).astype(jnp.float32),
        "W2": jnp.pad(params["W2"], ((0, ph), (0, ph))).astype(compute_dtype),
        "b2": jnp.pad(params["b2"], ((0, 0), (0, ph))).astype(jnp.float32),
        "W3": jnp.pad(params["W3"], ((0, ph), (0, 0))).astype(compute_dtype),
        "b3": params["b3"].astype(jnp.float32),
    }


def _vmem_cap_bytes():
    """Per-generation VMEM budget: 3/4 of reported capacity, 48 MiB fallback."""
    try:
        cap = getattr(pltpu.get_tpu_info(), "vmem_capacity_bytes", None)
        if cap:
            return int(cap) * 3 // 4        # ~96 MiB v5e/v6e, ~48 MiB v7x
    except Exception:
        pass
    return 48 << 20                         # safe on every generation


def _tile_vmem_bytes(tb, in_dim, h_pad, out_dim):
    bf16, f32 = 2, 4
    return (2 * (in_dim * h_pad + h_pad * h_pad + h_pad * out_dim) * bf16  # weights (double-buffered)
            + 2 * (2 * h_pad + out_dim) * f32                              # biases
            + 2 * tb * in_dim * bf16                                       # x tile x2 buffers
            + 2 * tb * out_dim * f32                                       # out tile x2 buffers
            + 2 * tb * h_pad * f32)                                        # h1/h2 live values


def factor_encoder_forward(x, prepared, latent_dim, *, batch_tile=1024):
    """x: [B, fc_input_dim].  prepared: output of prepare_params()."""
    B, in_dim = x.shape
    h_pad = prepared["W1"].shape[1]
    out_dim = prepared["W3"].shape[1]
    assert out_dim == 2 * latent_dim
    compute_dtype = prepared["W1"].dtype

    x = x.astype(compute_dtype)

    vmem_cap = _vmem_cap_bytes()
    # Number of grid steps: respect batch_tile, give v7x's two TensorCores
    # work when B is large, then derive tb to minimize last-block padding.
    n_steps = max(_cdiv(B, batch_tile), 2 if B > 2 * SUBLANE else 1)
    tb = _round_up(_cdiv(B, n_steps), SUBLANE)
    # If the tile would blow the VMEM budget, shrink the tile (more steps)
    # rather than clamping the limit below what the tile needs.
    while tb > SUBLANE and _tile_vmem_bytes(tb, in_dim, h_pad, out_dim) > vmem_cap:
        n_steps *= 2
        tb = _round_up(_cdiv(B, n_steps), SUBLANE)

    grid_steps = _cdiv(B, tb)
    b_padded = grid_steps * tb
    if b_padded != B:
        x = jnp.pad(x, ((0, b_padded - B), (0, 0)))

    bf16, f32 = 2, 4
    flops = 2 * b_padded * (in_dim * h_pad + h_pad * h_pad + h_pad * out_dim)
    bytes_accessed = (b_padded * in_dim * bf16
                      + (in_dim * h_pad + h_pad * h_pad + h_pad * out_dim) * bf16
                      + (2 * h_pad + out_dim) * f32
                      + b_padded * out_dim * f32)

    o = pl.pallas_call(
        _factor_encoder_kernel,
        out_shape=jax.ShapeDtypeStruct((b_padded, out_dim), jnp.float32),
        grid=(grid_steps,),
        in_specs=[
            pl.BlockSpec((tb, in_dim), lambda i: (i, 0)),        # x: tiled over batch
            # Weights/biases: full-shape blocks with a constant index_map so
            # they stay resident in VMEM across grid steps.
            # TODO(synk): pipeline_mode=pl.Buffered(1) would halve the resident
            # weight VMEM; left off for broad jax-version compatibility.
            pl.BlockSpec((in_dim, h_pad), lambda i: (0, 0)),     # W1
            pl.BlockSpec((1, h_pad), lambda i: (0, 0)),          # b1
            pl.BlockSpec((h_pad, h_pad), lambda i: (0, 0)),      # W2
            pl.BlockSpec((1, h_pad), lambda i: (0, 0)),          # b2
            pl.BlockSpec((h_pad, out_dim), lambda i: (0, 0)),    # W3
            pl.BlockSpec((1, out_dim), lambda i: (0, 0)),        # b3
        ],
        out_specs=pl.BlockSpec((tb, out_dim), lambda i: (i, 0)),  # true-width fused out
        compiler_params=pltpu.CompilerParams(
            dimension_semantics=("parallel",),
            vmem_limit_bytes=int(vmem_cap),
        ),
        cost_estimate=pl.CostEstimate(
            flops=flops, transcendentals=0, bytes_accessed=bytes_accessed),
    )(x, prepared["W1"], prepared["b1"], prepared["W2"], prepared["b2"],
      prepared["W3"], prepared["b3"])

    # Strip batch padding and split mean / logvar (free XLA-level slices;
    # equivalent to out.view(-1, 2, latent)[:, 0, :] / [:, 1, :]).
    o = o[:B]
    return o[:, :latent_dim], o[:, latent_dim:]


def init_params(key, fc_input_dim, expansion_factor, fc_output_dim):
    """Deterministic xavier-normal weights, zero biases (initialize_weights)."""
    hidden = fc_input_dim // expansion_factor + 1
    out_dim = fc_output_dim * 2

    def xavier(k, fan_in, fan_out):
        std = jnp.sqrt(2.0 / (fan_in + fan_out))
        # stored as (in, out) so the kernel computes x @ W
        return jax.random.normal(k, (fan_in, fan_out), jnp.float32) * std

    k1, k2, k3 = jax.random.split(key, 3)
    return {
        "W1": xavier(k1, fc_input_dim, hidden),
        "b1": jnp.zeros((1, hidden), jnp.float32),
        "W2": xavier(k2, hidden, hidden),
        "b2": jnp.zeros((1, hidden), jnp.float32),
        "W3": xavier(k3, hidden, out_dim),
        "b3": jnp.zeros((1, out_dim), jnp.float32),
    }


def reference_forward(x, params, latent_dim):
    """Plain-JAX f32 reference mirroring the PyTorch forward (eval mode)."""
    h1 = x @ params["W1"] + params["b1"]
    h1 = jnp.where(h1 > 0, h1, LEAKY_SLOPE * h1)
    h2 = h1 @ params["W2"] + params["b2"]
    h2 = jnp.where(h2 > 0, h2, LEAKY_SLOPE * h2)
    o = h2 @ params["W3"] + params["b3"]
    o = o.reshape(-1, 2, latent_dim)
    return o[:, 0, :], o[:, 1, :]


if __name__ == "__main__":
    # Small shapes consistent with the module's constructor kwargs.
    batch = 16
    fc_input_dim = 32
    expansion_factor = 4       # hidden = 32 // 4 + 1 = 9
    fc_output_dim = 8          # latent_dim = 8, fc_mean_var out = 16

    key = jax.random.PRNGKey(0)
    kx, kp = jax.random.split(key)

    x = jax.random.normal(kx, (batch, fc_input_dim), jnp.float32)
    params = init_params(kp, fc_input_dim, expansion_factor, fc_output_dim)

    prepared = prepare_params(params)      # pad + bf16-cast once, off hot path
    mean, logvar = factor_encoder_forward(x, prepared, fc_output_dim)
    jax.block_until_ready((mean, logvar))

    # Correctness check against the plain-JAX f32 reference (tolerance is
    # loosened because kernel operands are bf16 with f32 accumulation).
    ref_mean, ref_logvar = reference_forward(x, params, fc_output_dim)
    assert mean.shape == (batch, fc_output_dim)
    assert logvar.shape == (batch, fc_output_dim)
    assert jnp.allclose(mean, ref_mean, atol=5e-2, rtol=5e-2)
    assert jnp.allclose(logvar, ref_logvar, atol=5e-2, rtol=5e-2)

    print("KERNEL_OK")
</pallas_src>

<mosaic_0001>
module attributes {stable_mosaic.version = 11 : i64} {
  func.func @_factor_encoder_kernel(%arg0: i32, %arg1: memref<16x32xbf16, #tpu.memory_space<vmem>>, %arg2: memref<32x128xbf16, #tpu.memory_space<vmem>>, %arg3: memref<1x128xf32, #tpu.memory_space<vmem>>, %arg4: memref<128x128xbf16, #tpu.memory_space<vmem>>, %arg5: memref<1x128xf32, #tpu.memory_space<vmem>>, %arg6: memref<128x16xbf16, #tpu.memory_space<vmem>>, %arg7: memref<1x16xf32, #tpu.memory_space<vmem>>, %arg8: memref<16x16xf32, #tpu.memory_space<vmem>>) attributes {dimension_semantics = [#tpu.dimension_semantics<parallel>], iteration_bounds = array<i64: 1>, scalar_prefetch = 0 : i64, scratch_operands = 0 : i64, tpu.core_type = #tpu.core_type<tc>, window_params = [{transform_indices = @transform_0, window_bounds = array<i64: 16, 32>}, {pipeline_mode = #tpu.pipeline_mode<synchronous>, transform_indices = @transform_1, window_bounds = array<i64: 32, 128>}, {pipeline_mode = #tpu.pipeline_mode<synchronous>, transform_indices = @transform_2, window_bounds = array<i64: 1, 128>}, {pipeline_mode = #tpu.pipeline_mode<synchronous>, transform_indices = @transform_3, window_bounds = array<i64: 128, 128>}, {pipeline_mode = #tpu.pipeline_mode<synchronous>, transform_indices = @transform_4, window_bounds = array<i64: 1, 128>}, {pipeline_mode = #tpu.pipeline_mode<synchronous>, transform_indices = @transform_5, window_bounds = array<i64: 128, 16>}, {pipeline_mode = #tpu.pipeline_mode<synchronous>, transform_indices = @transform_6, window_bounds = array<i64: 1, 16>}, {transform_indices = @transform_7, window_bounds = array<i64: 16, 16>}]} {
    %c0 = arith.constant 0 : index
    %c0_0 = arith.constant 0 : index
    %0 = vector.load %arg1[%c0, %c0_0] : memref<16x32xbf16, #tpu.memory_space<vmem>>, vector<16x32xbf16>
    %c0_1 = arith.constant 0 : index
    %c0_2 = arith.constant 0 : index
    %1 = vector.load %arg2[%c0_1, %c0_2] : memref<32x128xbf16, #tpu.memory_space<vmem>>, vector<32x128xbf16>
    %cst = arith.constant dense<0.000000e+00> : vector<16x128xf32>
    %2 = tpu.matmul %0, %1, %cst {dimension_numbers = #tpu.dot_dimension_numbers<[1], [0], [0], [1], [0, 0, 1, 1], [], []>} : vector<16x32xbf16>, vector<32x128xbf16>, vector<16x128xf32> -> vector<16x128xf32>
    %c0_3 = arith.constant 0 : index
    %c0_4 = arith.constant 0 : index
    %3 = vector.load %arg3[%c0_3, %c0_4] : memref<1x128xf32, #tpu.memory_space<vmem>>, vector<1x128xf32>
    %4 = vector.broadcast %3 : vector<1x128xf32> to vector<16x128xf32>
    %5 = arith.addf %2, %4 : vector<16x128xf32>
    %cst_5 = arith.constant 0.00999999977 : f32
    %6 = vector.broadcast %cst_5 : f32 to vector<16x128xf32>
    %7 = arith.mulf %6, %5 : vector<16x128xf32>
    %8 = arith.maximumf %5, %7 : vector<16x128xf32>
    %9 = arith.truncf %8 : vector<16x128xf32> to vector<16x128xbf16>
    %c0_6 = arith.constant 0 : index
    %c0_7 = arith.constant 0 : index
    %10 = vector.load %arg4[%c0_6, %c0_7] : memref<128x128xbf16, #tpu.memory_space<vmem>>, vector<128x128xbf16>
    %cst_8 = arith.constant dense<0.000000e+00> : vector<16x128xf32>
    %11 = tpu.matmul %9, %10, %cst_8 {dimension_numbers = #tpu.dot_dimension_numbers<[1], [0], [0], [1], [0, 0, 1, 1], [], []>} : vector<16x128xbf16>, vector<128x128xbf16>, vector<16x128xf32> -> vector<16x128xf32>
    %c0_9 = arith.constant 0 : index
    %c0_10 = arith.constant 0 : index
    %12 = vector.load %arg5[%c0_9, %c0_10] : memref<1x128xf32, #tpu.memory_space<vmem>>, vector<1x128xf32>
    %13 = vector.broadcast %12 : vector<1x128xf32> to vector<16x128xf32>
    %14 = arith.addf %11, %13 : vector<16x128xf32>
    %cst_11 = arith.constant 0.00999999977 : f32
    %15 = vector.broadcast %cst_11 : f32 to vector<16x128xf32>
    %16 = arith.mulf %15, %14 : vector<16x128xf32>
    %17 = arith.maximumf %14, %16 : vector<16x128xf32>
    %18 = arith.truncf %17 : vector<16x128xf32> to vector<16x128xbf16>
    %c0_12 = arith.constant 0 : index
    %c0_13 = arith.constant 0 : index
    %19 = vector.load %arg6[%c0_12, %c0_13] : memref<128x16xbf16, #tpu.memory_space<vmem>>, vector<128x16xbf16>
    %cst_14 = arith.constant dense<0.000000e+00> : vector<16x16xf32>
    %20 = tpu.matmul %18, %19, %cst_14 {dimension_numbers = #tpu.dot_dimension_numbers<[1], [0], [0], [1], [0, 0, 1, 1], [], []>} : vector<16x128xbf16>, vector<128x16xbf16>, vector<16x16xf32> -> vector<16x16xf32>
    %c0_15 = arith.constant 0 : index
    %c0_16 = arith.constant 0 : index
    %21 = vector.load %arg7[%c0_15, %c0_16] : memref<1x16xf32, #tpu.memory_space<vmem>>, vector<1x16xf32>
    %22 = vector.broadcast %21 : vector<1x16xf32> to vector<16x16xf32>
    %23 = arith.addf %20, %22 : vector<16x16xf32>
    %c0_17 = arith.constant 0 : index
    %c0_18 = arith.constant 0 : index
    %24 = vector.load %arg8[%c0_17, %c0_18] : memref<16x16xf32, #tpu.memory_space<vmem>>, vector<16x16xf32>
    tpu.vector_store %arg8[%c0_17, %c0_18], %23 {strides = array<i32>} : memref<16x16xf32, #tpu.memory_space<vmem>>, vector<16x16xf32>,
    return
  }
  func.func @transform_0(%arg0: i32) -> (i32, i32) {
    %c0_i32 = arith.constant 0 : i32
    %c0_i32_0 = arith.constant 0 : i32
    return %arg0, %c0_i32 : i32, i32
  }
  func.func @transform_1(%arg0: i32) -> (i32, i32) {
    %c0_i32 = arith.constant 0 : i32
    %c0_i32_0 = arith.constant 0 : i32
    %c0_i32_1 = arith.constant 0 : i32
    return %c0_i32, %c0_i32_0 : i32, i32
  }
  func.func @transform_2(%arg0: i32) -> (i32, i32) {
    %c0_i32 = arith.constant 0 : i32
    %c0_i32_0 = arith.constant 0 : i32
    %c0_i32_1 = arith.constant 0 : i32
    return %c0_i32, %c0_i32_0 : i32, i32
  }
  func.func @transform_3(%arg0: i32) -> (i32, i32) {
    %c0_i32 = arith.constant 0 : i32
    %c0_i32_0 = arith.constant 0 : i32
    %c0_i32_1 = arith.constant 0 : i32
    return %c0_i32, %c0_i32_0 : i32, i32
  }
  func.func @transform_4(%arg0: i32) -> (i32, i32) {
    %c0_i32 = arith.constant 0 : i32
    %c0_i32_0 = arith.constant 0 : i32
    %c0_i32_1 = arith.constant 0 : i32
    return %c0_i32, %c0_i32_0 : i32, i32
  }
  func.func @transform_5(%arg0: i32) -> (i32, i32) {
    %c0_i32 = arith.constant 0 : i32
    %c0_i32_0 = arith.constant 0 : i32
    %c0_i32_1 = arith.constant 0 : i32
    return %c0_i32, %c0_i32_0 : i32, i32
  }
  func.func @transform_6(%arg0: i32) -> (i32, i32) {
    %c0_i32 = arith.constant 0 : i32
    %c0_i32_0 = arith.constant 0 : i32
    %c0_i32_1 = arith.constant 0 : i32
    return %c0_i32, %c0_i32_0 : i32, i32
  }
  func.func @transform_7(%arg0: i32) -> (i32, i32) {
    %c0_i32 = arith.constant 0 : i32
    %c0_i32_0 = arith.constant 0 : i32
    return %arg0, %c0_i32 : i32, i32
  }
}

</mosaic_0001>

<bundles_post_ra>
// kernel: tpu_custom_call.1
= control target key start
LH: loop header
LB: loop body
LE: loop exit
PB: predicated region body
PF: predicated region fallthrough
CT: control target
= control target key end

     0   :  { %12 = vsyncpa [#allocation3], 0  ;;  %s554_s0 = inlined_call_operand.vmem [shape: bf16[16,32], index: 0, kind: input, shape index: {}]   ;;  %s555_s1 = inlined_call_operand.hbm [shape: bf16[32,128], index: 1, kind: input, shape index: {}]   ;;  %s556_s2 = inlined_call_operand.vmem [shape: f32[1,128], index: 2, kind: input, shape index: {}]   ;;  %s557_s3 = inlined_call_operand.vmem [shape: bf16[128,128], index: 3, kind: input, shape index: {}]   ;;  %s558_s4 = inlined_call_operand.vmem [shape: f32[1,128], index: 4, kind: input, shape index: {}]   ;;  %s559_s5 = inlined_call_operand.vmem [shape: bf16[128,16], index: 5, kind: input, shape index: {}]   ;;  %s560_s6 = inlined_call_operand.vmem [shape: f32[1,16], index: 6, kind: input, shape index: {}]   ;;  %s561_s7 = inlined_call_operand.hbm [shape: f32[16,16], index: 7, kind: output, shape index: {}]  }
   0x1   :  { %13 = vsyncpa [#allocation4], 0  ;;  %s20_s26 = sshll.u32 %s555_s1, 4  ;;  %s442_s27 = smov [#allocation2]   ;;  %s21_s26 = int_to_ptr.hbm [resolvable:$true] %s20_s26 }
   0x2   :  { %s22_s28 = sshll.u32 %s442_s27, 4  ;;  %s443_s29 = smov 64   ;;  %s23_s28 = int_to_ptr.vmem [resolvable:$true] %s22_s28 }
   0x3   :  { %s444_s30 = smov 4  }
   0x4   :  { %28 = dma.hbm_to_vmem [thread:$0]  %s21_s26, 256, %s23_s28, [#allocation3], %s443_s29, %s443_s29, %s444_s30  }
   0x5   :  { %438 = dma.done.wait [#allocation3], 256  }
   0x6   :  { %439 = vsyncadd [#allocation3], 4294967040  ;;  %v364_v0 = vld [vmem:[#allocation2 + $0x8] sm:$0xff]  ;;  %v372_v1 = vld [vmem:[%s557_s3 + $0x38] sm:$0xff]  ;;  %vm71_vm0 = vcmask 261120   ;;  %vm263_vm1 = vcmask 130048  }
   0x7   :  { %81 = vmatpush.bf16.msra.mxu0 %v364_v0  ;;  %v363_v2 = vld [vmem:[#allocation2] sm:$0xff]  ;;  %162 = vmatpush.bf16.msra.mxu1 %v372_v1  ;;  %v371_v3 = vld [vmem:[%s557_s3 + $0x30] sm:$0xff]  ;;  %v370_v5 = vld [vmem:[%s557_s3 + $0x28] sm:$0xff]  ;;  %s272_s21 = sshll.u32 %s561_s7, 4  ;;  %s446_s22 = smov 128   ;;  %s273_s21 = int_to_ptr.hbm [resolvable:$true] %s272_s21 }
   0x8   :  { %v362_v4 = vld [vmem:[%s554_s0] sm:$0xff]  ;;  %v368_v7 = vld [vmem:[%s557_s3 + $0x18] sm:$0xff]  ;;  %v367_v8 = vld [vmem:[%s557_s3 + $0x10] sm:$0xff]  ;;  %s447_s23 = smov 8  }
   0x9   :  { %v369_v6 = vld [vmem:[%s557_s3 + $0x20] sm:$0xff]  ;;  %v366_v9 = vld [vmem:[%s557_s3 + $0x8] sm:$0xff]  ;;  %v380_v11 = vld [vmem:[%s559_s5 + $0x38] sm:$0xff] }
   0xa   :  { %v365_v10 = vld [vmem:[%s557_s3] sm:$0xff]  ;;  %249 = vmatpush.bf16.msra.mxu2 %v380_v11  ;;  %v379_v12 = vld [vmem:[%s559_s5 + $0x30] sm:$0xff]  ;;  %v378_v13 = vld [vmem:[%s559_s5 + $0x28] sm:$0xff] }
   0xb   :  { %82 = vmatpush.bf16.msra.mxu0 %v363_v2  ;;  %163 = vmatpush.bf16.msra.mxu1 %v371_v3  ;;  %v377_v14 = vld [vmem:[%s559_s5 + $0x20] sm:$0xff]  ;;  %v376_v25 = vld [vmem:[%s559_s5 + $0x18] sm:$0xff]  ;;  %v375_v26 = vld [vmem:[%s559_s5 + $0x10] sm:$0xff] }
   0xc   :  { %v387_v16 = vld [vmem:[%s556_s2] ss:$0 sm:$0xff]  ;;  %v374_v27 = vld [vmem:[%s559_s5 + $0x8] sm:$0xff] }
   0xd   :  { %v373_v28 = vld [vmem:[%s559_s5] sm:$0xff]  ;;  %s445_s5 = smov [#allocation5]  }
   0xe   :  { %297 = vmatmul.msk.bf16.vlgmr.msra.gmra.mxu0 %vm71_vm0, %v362_v4  ;;  %250 = vmatpush.bf16.msra.mxu2 %v379_v12  ;;  %v388_v30 = vld [vmem:[%s558_s4] ss:$0 sm:$0xff]  ;;  %s270_s19 = sshll.u32 %s445_s5, 4  ;;  %s271_s19 = int_to_ptr.vmem [resolvable:$true] %s270_s19 }
   0xf   :  { %164 = vmatpush.bf16.msra.mxu1 %v370_v5  ;;  %v389_v39 = vld [vmem:[%s560_s6] ss:$0 sm:$0xff] }
  0x12   :  { %251 = vmatpush.bf16.msra.mxu2 %v378_v13 }
  0x13   :  { %165 = vmatpush.bf16.msra.mxu1 %v369_v6 }
  0x16   :  { %252 = vmatpush.bf16.msra.mxu2 %v377_v14 }
  0x17   :  { %166 = vmatpush.bf16.msra.mxu1 %v368_v7 }
  0x1a   :  { %253 = vmatpush.bf16.msra.mxu2 %v376_v25 }
  0x1b   :  { %167 = vmatpush.bf16.msra.mxu1 %v367_v8 }
  0x1e   :  { %254 = vmatpush.bf16.msra.mxu2 %v375_v26 }
  0x1f   :  { %168 = vmatpush.bf16.msra.mxu1 %v366_v9 }
  0x22   :  { %255 = vmatpush.bf16.msra.mxu2 %v374_v27 }
  0x23   :  { %169 = vmatpush.bf16.msra.mxu1 %v365_v10 }
  0x26   :  { %256 = vmatpush.bf16.msra.mxu2 %v373_v28 }
  0x8b   :  { %v84_v15 = vpop.f32.mrf.mxu0 }
  0x8c   :  { %v85_v17 = vadd.f32 %v387_v16, %v84_v15 }
  0x8e   :  { %v89_v19 = vmul.f32 0.01, %v85_v17 }
  0x90   :  { %v91_v22 = vmax.f32 %v85_v17, %v89_v19 }
  0x93   :  { %v86_v18 = vpop.f32.mrf.mxu0 }
  0x94   :  { %v87_v20 = vadd.f32 %v387_v16, %v86_v18 }
  0x96   :  { %v90_v21 = vmul.f32 0.01, %v87_v20 }
  0x98   :  { %v92_v23 = vmax.f32 %v87_v20, %v90_v21 }
  0x9a   :  { %v93_v24 = vpack.c.bf16 %v92_v23, %v91_v22 }
  0x9c   :  { %170 = vmatmul.bf16.vlgmr.msra.gmra.mxu1 %v93_v24 }
 0x119   :  { %v171_v29 = vpop.f32.mrf.mxu1 }
 0x11a   :  { %v172_v31 = vadd.f32 %v388_v30, %v171_v29 }
 0x11c   :  { %v176_v33 = vmul.f32 0.01, %v172_v31 }
 0x11e   :  { %v178_v36 = vmax.f32 %v172_v31, %v176_v33 }
 0x121   :  { %v173_v32 = vpop.f32.mrf.mxu1 }
 0x122   :  { %v174_v34 = vadd.f32 %v388_v30, %v173_v32 }
 0x124   :  { %v177_v35 = vmul.f32 0.01, %v174_v34 }
 0x126   :  { %v179_v37 = vmax.f32 %v174_v34, %v177_v35 }
 0x128   :  { %v180_v38 = vpack.c.bf16 %v179_v37, %v178_v36 }
 0x12a   :  { %257 = vmatmul.bf16.vlgmr.msra.gmra.mxu2 %v180_v38 }
 0x1ad   :  { %v258_v40 = vpop.f32.mrf.mxu2 }
 0x1ae   :  { %v259_v41 = vadd.f32 %v389_v39, %v258_v40 }
 0x1b0   :  { %264 = vst.msk [vmem:[#allocation5] sm:$0xff] %vm263_vm1, %v259_v41 }
 0x1b5   :  { %v260_v42 = vpop.f32.mrf.mxu2 }
 0x1b6   :  { %v261_v43 = vadd.f32 %v389_v39, %v260_v42 }
 0x1b8   :  { %265 = vst.msk [vmem:[#allocation5 + $0x8] sm:$0xff] %vm263_vm1, %v261_v43 }
 0x1b9   :  { %278 = dma.vmem_to_hbm [thread:$0]  %s271_s19, 256, %s273_s21, [#allocation4], %s446_s22, %s446_s22, %s447_s23  }
 0x1ba   :  { %440 = dma.done.wait [#allocation4], 256  }
 0x1bb   :  { %441 = vsyncadd [#allocation4], 4294967040 }
 0x1bc   :  { %283 = vsyncpa [#allocation3], 1 }
 0x1bd   :  { %284 = vsyncpa [#allocation4], 1 }

</bundles_post_ra>
